<compile_context>
chip_gen: v7x
topology: tpu7x:2x2x1
jax: 0.10.0
libtpu: 0.0.40
codegen_flags: <defaults>
</compile_context>

<pallas_src>
import jax
import jax.numpy as jnp
import numpy as np
from jax.experimental import pallas as pl
from jax.experimental.pallas import tpu as pltpu


# ------------------------------ Pallas kernel -------------------------------

def _segmentor_kernel(cols_ref, w1a_ref, sel_ref, w2s_ref, b2_ref,
                      wht_ref, bh_ref, bt_ref, o_ref):
    """Fully fused forward for the whole (lane-folded) batch; intermediates stay in vregs.

    cols_ref : (9*Cin+1, N*H1*W1)    im2col of the raw input + ones row (bias fold)
    w1a_ref  : (hid, 9*Cin+1)        conv1 weight with bias column appended
    sel_ref  : (9, N*H1*W1, N*H2*W2) block-diagonal 0/1 shift selectors (in-kernel im2col)
    w2s_ref  : (9*hid, hid)          conv2 weights stacked over taps, rows = (tap, cout)
    b2_ref   : (hid, 1)
    wht_ref  : (ncls, hid)           1x1 head weight, transposed
    bh_ref   : (ncls, 1)
    bt_ref   : (N*H2*W2, N*Hout*Wout) block-diagonal kron(Ah, Aw)^T bilinear matrix
    o_ref    : (ncls, N*Hout*Wout)
    """
    hid = w2s_ref.shape[1]
    taps = sel_ref.shape[0]

    # conv1 (3x3, s=2, p=1) + bias (folded into augmented weight) + ReLU: one matmul.
    f1 = jnp.maximum(jnp.dot(w1a_ref[...], cols_ref[...],
                             preferred_element_type=jnp.float32), 0.0)   # (hid, N*H1*W1)

    # conv2 (3x3, s=2, p=1): ONE fat weight matmul, then 9 selector matmuls on
    # vreg-aligned (multiple-of-8) sublane slices — 10 MXU ops instead of 18 tiny ones.
    wf = jnp.dot(w2s_ref[...], f1,
                 preferred_element_type=jnp.float32)                     # (9*hid, N*H1*W1)
    acc = b2_ref[...] + jnp.dot(wf[0:hid, :], sel_ref[0],
                                preferred_element_type=jnp.float32)
    for kk in range(1, taps):                                            # static, unrolled
        acc = acc + jnp.dot(wf[kk * hid:(kk + 1) * hid, :], sel_ref[kk],
                            preferred_element_type=jnp.float32)
    f2 = jnp.maximum(acc, 0.0)                                           # (hid, N*H2*W2)

    # 1x1 head. Bias may be added before the upsample ONLY because every column of
    # bt sums to 1 (row-stochastic bilinear, align_corners=False; asserted host-side).
    logits = jnp.dot(wht_ref[...], f2,
                     preferred_element_type=jnp.float32) + bh_ref[...]   # (ncls, N*H2*W2)

    # bilinear upsample as ONE lane-dense matmul: (ncls, N*16) @ (N*16, N*256).
    o_ref[...] = jnp.dot(logits, bt_ref[...],
                         preferred_element_type=jnp.float32).astype(o_ref.dtype)


# ------------------------------ host helpers --------------------------------

def _conv_out(size, k, stride, pad):
    return (size + 2 * pad - k) // stride + 1


def _im2col_t(x_nhwc, k, stride, pad):
    """Patch matrix of the *raw input*, channels-first: (N, k*k*C, Ho*Wo)."""
    N, H, W, C = x_nhwc.shape
    Ho = _conv_out(H, k, stride, pad)
    Wo = _conv_out(W, k, stride, pad)
    xp = jnp.pad(x_nhwc, ((0, 0), (pad, pad), (pad, pad), (0, 0)))
    slabs = [xp[:, kh:kh + stride * Ho:stride, kw:kw + stride * Wo:stride, :]
             for kh in range(k) for kw in range(k)]
    patches = jnp.stack(slabs, axis=1)                  # (N, k*k, Ho, Wo, C)
    patches = jnp.transpose(patches, (0, 1, 4, 2, 3))   # (N, k*k, C, Ho, Wo)
    return patches.reshape(N, k * k * C, Ho * Wo), Ho, Wo


def _shift_selectors(h_in, w_in, h_out, w_out, k, stride, pad):
    """0/1 matrices so that  f1 @ sel[kk]  gathers the (kh,kw)-shifted pixels.

    sel[kh*k+kw, h*w_in+w, ho*w_out+wo] = 1 iff h = stride*ho+kh-pad, w = stride*wo+kw-pad
    (in bounds).  Out-of-bounds taps contribute zero (== zero padding).
    """
    sel = np.zeros((k * k, h_in * w_in, h_out * w_out), np.float32)
    for kh in range(k):
        for kw in range(k):
            for ho in range(h_out):
                for wo in range(w_out):
                    h = stride * ho + kh - pad
                    w = stride * wo + kw - pad
                    if 0 <= h < h_in and 0 <= w < w_in:
                        sel[kh * k + kw, h * w_in + w, ho * w_out + wo] = 1.0
    return sel


def bilinear_matrix(out_size, in_size):
    """Row-stochastic interpolation matrix matching PyTorch align_corners=False."""
    scale = in_size / out_size
    dst = np.arange(out_size, dtype=np.float64)
    src = np.maximum(scale * (dst + 0.5) - 0.5, 0.0)   # PyTorch clamps negative src to 0
    i0 = np.minimum(np.floor(src).astype(np.int64), in_size - 1)
    i1 = np.minimum(i0 + 1, in_size - 1)
    w1 = src - i0
    w0 = 1.0 - w1
    A = np.zeros((out_size, in_size), dtype=np.float32)
    A[np.arange(out_size), i0] += w0.astype(np.float32)
    A[np.arange(out_size), i1] += w1.astype(np.float32)
    return A


def init_params(key, in_ch=4, hidden=32, num_classes=5):
    k1, k2, k3, k4, k5, k6 = jax.random.split(key, 6)
    return {
        "w1": 0.1 * jax.random.normal(k1, (3, 3, in_ch, hidden), jnp.float32),
        "b1": 0.1 * jax.random.normal(k2, (hidden,), jnp.float32),
        "w2": 0.1 * jax.random.normal(k3, (3, 3, hidden, hidden), jnp.float32),
        "b2": 0.1 * jax.random.normal(k4, (hidden,), jnp.float32),
        "wh": 0.1 * jax.random.normal(k5, (1, 1, hidden, num_classes), jnp.float32),
        "bh": 0.1 * jax.random.normal(k6, (num_classes,), jnp.float32),
    }


# ------------------------------ fused forward -------------------------------

def segmentor_forward(params, x_nchw, img_shape=None):
    """Mirror of Segmentor.forward: backbone -> head -> bilinear upsample to out_shape."""
    out_hw = tuple(x_nchw.shape[2:]) if img_shape is None else tuple(img_shape)
    # TODO(synk): trilinear (3-D) branch of F.interpolate not implemented (2-D only).
    assert len(out_hw) == 2, "only the 2-D bilinear branch is implemented"
    N, cin, H, W = x_nchw.shape
    hid = params["w1"].shape[-1]
    ncls = params["wh"].shape[-1]
    Hout, Wout = out_hw

    # --- host-side layout plumbing (touches only the raw input and the weights) ---
    x_nhwc = jnp.transpose(x_nchw, (0, 2, 3, 1)).astype(jnp.float32)
    cols1, H1, W1 = _im2col_t(x_nhwc, 3, 2, 1)                 # (N, 9*cin, H1*W1)
    H2, W2 = _conv_out(H1, 3, 2, 1), _conv_out(W1, 3, 2, 1)
    nq1, nq2, nqo = N * H1 * W1, N * H2 * W2, N * Hout * Wout

    # fold batch into the lane axis: image n occupies lanes [n*H1*W1, (n+1)*H1*W1)
    cols_f = jnp.transpose(cols1, (1, 0, 2)).reshape(9 * cin, nq1)
    cols_aug = jnp.concatenate(
        [cols_f, jnp.ones((1, nq1), jnp.float32)], axis=0)     # (9*cin+1, N*H1*W1)

    w1t = params["w1"].reshape(9 * cin, hid).T.astype(jnp.float32)
    w1_aug = jnp.concatenate(
        [w1t, params["b1"].reshape(hid, 1).astype(jnp.float32)], axis=1)   # (hid, 9*cin+1)

    w2s = jnp.transpose(params["w2"], (0, 1, 3, 2)).reshape(9 * hid, hid)  # (9*hid, hid)
    w2s = w2s.astype(jnp.float32)
    b2c = params["b2"].reshape(hid, 1).astype(jnp.float32)
    wht = params["wh"].reshape(hid, ncls).T.astype(jnp.float32)            # (ncls, hid)
    bhc = params["bh"].reshape(ncls, 1).astype(jnp.float32)

    # block-diagonal conv2 shift selectors (in-kernel im2col across the folded batch)
    sel1 = _shift_selectors(H1, W1, H2, W2, 3, 2, 1)            # (9, H1*W1, H2*W2)
    sel_bd = np.zeros((9, nq1, nq2), np.float32)
    for n in range(N):
        sel_bd[:, n * H1 * W1:(n + 1) * H1 * W1,
               n * H2 * W2:(n + 1) * H2 * W2] = sel1

    # block-diagonal bilinear matrix -> one lane-dense (N*Hout*Wout wide) output matmul
    bt1 = np.kron(bilinear_matrix(Hout, H2), bilinear_matrix(Wout, W2)).T  # (H2W2, HoWo)
    bt_bd = np.zeros((nq2, nqo), np.float32)
    for n in range(N):
        bt_bd[n * H2 * W2:(n + 1) * H2 * W2,
              n * Hout * Wout:(n + 1) * Hout * Wout] = bt1
    # head-bias-before-bilinear is only valid for a column-stochastic bt — guard it.
    assert np.allclose(bt_bd.sum(axis=0), 1.0, atol=1e-6)

    sel_bd = jnp.asarray(sel_bd)
    bt_bd = jnp.asarray(bt_bd)

    flops = (2 * hid * (9 * cin + 1) * nq1          # conv1
             + 2 * (9 * hid) * hid * nq1            # conv2 fat weight matmul
             + 9 * 2 * hid * nq1 * nq2              # conv2 selector matmuls
             + 2 * ncls * hid * nq2                 # head
             + 2 * ncls * nq2 * nqo)                # bilinear
    bytes_accessed = 4 * (cols_aug.size + w1_aug.size + sel_bd.size + w2s.size
                          + b2c.size + wht.size + bhc.size + bt_bd.size + ncls * nqo)

    out = pl.pallas_call(
        _segmentor_kernel,
        out_shape=jax.ShapeDtypeStruct((ncls, nqo), jnp.float32),
        grid=(1,),
        in_specs=[
            pl.BlockSpec((9 * cin + 1, nq1), lambda i: (0, 0)),
            pl.BlockSpec((hid, 9 * cin + 1), lambda i: (0, 0)),
            pl.BlockSpec((9, nq1, nq2), lambda i: (0, 0, 0)),
            pl.BlockSpec((9 * hid, hid), lambda i: (0, 0)),
            pl.BlockSpec((hid, 1), lambda i: (0, 0)),
            pl.BlockSpec((ncls, hid), lambda i: (0, 0)),
            pl.BlockSpec((ncls, 1), lambda i: (0, 0)),
            pl.BlockSpec((nq2, nqo), lambda i: (0, 0)),
        ],
        out_specs=pl.BlockSpec((ncls, nqo), lambda i: (0, 0)),
        compiler_params=pltpu.CompilerParams(
            dimension_semantics=("arbitrary",)),
        cost_estimate=pl.CostEstimate(flops=int(flops), transcendentals=0,
                                      bytes_accessed=int(bytes_accessed)),
    )(cols_aug, w1_aug, sel_bd, w2s, b2c, wht, bhc, bt_bd)

    # lane-dense (ncls, N*Hout*Wout) -> NCHW; contiguous reshape + wrapper-side transpose.
    return jnp.transpose(out.reshape(ncls, N, Hout, Wout), (1, 0, 2, 3))


# ---------------------------- pure-JAX reference ----------------------------

def reference_forward(params, x_nchw):
    x = jnp.transpose(x_nchw, (0, 2, 3, 1))

    def conv(x, w, b, stride, pad, relu):
        y = jax.lax.conv_general_dilated(
            x, w, window_strides=(stride, stride),
            padding=((pad, pad), (pad, pad)),
            dimension_numbers=("NHWC", "HWIO", "NHWC"))
        y = y + b
        return jnp.maximum(y, 0.0) if relu else y

    f = conv(x, params["w1"], params["b1"], 2, 1, True)
    f = conv(f, params["w2"], params["b2"], 2, 1, True)
    lg = conv(f, params["wh"], params["bh"], 1, 0, False)
    lg = jnp.transpose(lg, (0, 3, 1, 2))
    ah = jnp.asarray(bilinear_matrix(x_nchw.shape[2], lg.shape[2]))
    aw = jnp.asarray(bilinear_matrix(x_nchw.shape[3], lg.shape[3]))
    return jnp.einsum("oh,nchw,pw->ncop", ah, lg, aw)


if __name__ == "__main__":
    key = jax.random.PRNGKey(0)
    pkey, xkey = jax.random.split(key)
    params = init_params(pkey)
    x = jax.random.normal(xkey, (2, 4, 16, 16), jnp.float32)   # NCHW like PyTorch

    out = jax.block_until_ready(segmentor_forward(params, x))

    ref = reference_forward(params, x)
    np.testing.assert_allclose(np.asarray(out), np.asarray(ref), rtol=1e-3, atol=1e-3)
    assert out.shape == (2, 5, 16, 16)
    print("KERNEL_OK")
</pallas_src>

<mosaic_0001>
module attributes {stable_mosaic.version = 11 : i64} {
  func.func @_segmentor_kernel(%arg0: i32, %arg1: memref<37x128xf32, #tpu.memory_space<vmem>>, %arg2: memref<32x37xf32, #tpu.memory_space<vmem>>, %arg3: memref<9x128x32xf32, #tpu.memory_space<vmem>>, %arg4: memref<288x32xf32, #tpu.memory_space<vmem>>, %arg5: memref<32x1xf32, #tpu.memory_space<vmem>>, %arg6: memref<5x32xf32, #tpu.memory_space<vmem>>, %arg7: memref<5x1xf32, #tpu.memory_space<vmem>>, %arg8: memref<32x512xf32, #tpu.memory_space<vmem>>, %arg9: memref<5x512xf32, #tpu.memory_space<vmem>>) attributes {dimension_semantics = [#tpu.dimension_semantics<arbitrary>], iteration_bounds = array<i64: 1>, scalar_prefetch = 0 : i64, scratch_operands = 0 : i64, tpu.core_type = #tpu.core_type<tc>, window_params = [{pipeline_mode = #tpu.pipeline_mode<synchronous>, transform_indices = @transform_0, window_bounds = array<i64: 37, 128>}, {pipeline_mode = #tpu.pipeline_mode<synchronous>, transform_indices = @transform_1, window_bounds = array<i64: 32, 37>}, {pipeline_mode = #tpu.pipeline_mode<synchronous>, transform_indices = @transform_2, window_bounds = array<i64: 9, 128, 32>}, {pipeline_mode = #tpu.pipeline_mode<synchronous>, transform_indices = @transform_3, window_bounds = array<i64: 288, 32>}, {pipeline_mode = #tpu.pipeline_mode<synchronous>, transform_indices = @transform_4, window_bounds = array<i64: 32, 1>}, {pipeline_mode = #tpu.pipeline_mode<synchronous>, transform_indices = @transform_5, window_bounds = array<i64: 5, 32>}, {pipeline_mode = #tpu.pipeline_mode<synchronous>, transform_indices = @transform_6, window_bounds = array<i64: 5, 1>}, {pipeline_mode = #tpu.pipeline_mode<synchronous>, transform_indices = @transform_7, window_bounds = array<i64: 32, 512>}, {pipeline_mode = #tpu.pipeline_mode<synchronous>, transform_indices = @transform_8, window_bounds = array<i64: 5, 512>}]} {
    %c0 = arith.constant 0 : index
    %c0_0 = arith.constant 0 : index
    %0 = vector.load %arg2[%c0, %c0_0] : memref<32x37xf32, #tpu.memory_space<vmem>>, vector<32x37xf32>
    %c0_1 = arith.constant 0 : index
    %c0_2 = arith.constant 0 : index
    %1 = vector.load %arg1[%c0_1, %c0_2] : memref<37x128xf32, #tpu.memory_space<vmem>>, vector<37x128xf32>
    %cst = arith.constant dense<0.000000e+00> : vector<32x128xf32>
    %2 = tpu.matmul %0, %1, %cst {dimension_numbers = #tpu.dot_dimension_numbers<[1], [0], [0], [1], [0, 0, 1, 1], [], []>} : vector<32x37xf32>, vector<37x128xf32>, vector<32x128xf32> -> vector<32x128xf32>
    %cst_3 = arith.constant 0.000000e+00 : f32
    %3 = vector.broadcast %cst_3 : f32 to vector<32x128xf32>
    %4 = arith.maximumf %2, %3 : vector<32x128xf32>
    %c0_4 = arith.constant 0 : index
    %c0_5 = arith.constant 0 : index
    %5 = vector.load %arg4[%c0_4, %c0_5] : memref<288x32xf32, #tpu.memory_space<vmem>>, vector<288x32xf32>
    %cst_6 = arith.constant dense<0.000000e+00> : vector<288x128xf32>
    %6 = tpu.matmul %5, %4, %cst_6 {dimension_numbers = #tpu.dot_dimension_numbers<[1], [0], [0], [1], [0, 0, 1, 1], [], []>} : vector<288x32xf32>, vector<32x128xf32>, vector<288x128xf32> -> vector<288x128xf32>
    %c0_7 = arith.constant 0 : index
    %c0_8 = arith.constant 0 : index
    %7 = vector.load %arg5[%c0_7, %c0_8] : memref<32x1xf32, #tpu.memory_space<vmem>>, vector<32x1xf32>
    %8 = vector.extract_strided_slice %6 {offsets = [0, 0], sizes = [32, 128], strides = [1, 1]} : vector<288x128xf32> to vector<32x128xf32>
    %c0_9 = arith.constant 0 : index
    %c0_10 = arith.constant 0 : index
    %c0_11 = arith.constant 0 : index
    %9 = vector.load %arg3[%c0_9, %c0_10, %c0_11] : memref<9x128x32xf32, #tpu.memory_space<vmem>>, vector<1x128x32xf32>
    %10 = vector.shape_cast %9 : vector<1x128x32xf32> to vector<128x32xf32>
    %cst_12 = arith.constant dense<0.000000e+00> : vector<32x32xf32>
    %11 = tpu.matmul %8, %10, %cst_12 {dimension_numbers = #tpu.dot_dimension_numbers<[1], [0], [0], [1], [0, 0, 1, 1], [], []>} : vector<32x128xf32>, vector<128x32xf32>, vector<32x32xf32> -> vector<32x32xf32>
    %12 = vector.broadcast %7 : vector<32x1xf32> to vector<32x32xf32>
    %13 = arith.addf %12, %11 : vector<32x32xf32>
    %14 = vector.extract_strided_slice %6 {offsets = [32, 0], sizes = [32, 128], strides = [1, 1]} : vector<288x128xf32> to vector<32x128xf32>
    %c1 = arith.constant 1 : index
    %c0_13 = arith.constant 0 : index
    %c0_14 = arith.constant 0 : index
    %15 = vector.load %arg3[%c1, %c0_13, %c0_14] : memref<9x128x32xf32, #tpu.memory_space<vmem>>, vector<1x128x32xf32>
    %16 = vector.shape_cast %15 : vector<1x128x32xf32> to vector<128x32xf32>
    %cst_15 = arith.constant dense<0.000000e+00> : vector<32x32xf32>
    %17 = tpu.matmul %14, %16, %cst_15 {dimension_numbers = #tpu.dot_dimension_numbers<[1], [0], [0], [1], [0, 0, 1, 1], [], []>} : vector<32x128xf32>, vector<128x32xf32>, vector<32x32xf32> -> vector<32x32xf32>
    %18 = arith.addf %13, %17 : vector<32x32xf32>
    %19 = vector.extract_strided_slice %6 {offsets = [64, 0], sizes = [32, 128], strides = [1, 1]} : vector<288x128xf32> to vector<32x128xf32>
    %c2 = arith.constant 2 : index
    %c0_16 = arith.constant 0 : index
    %c0_17 = arith.constant 0 : index
    %20 = vector.load %arg3[%c2, %c0_16, %c0_17] : memref<9x128x32xf32, #tpu.memory_space<vmem>>, vector<1x128x32xf32>
    %21 = vector.shape_cast %20 : vector<1x128x32xf32> to vector<128x32xf32>
    %cst_18 = arith.constant dense<0.000000e+00> : vector<32x32xf32>
    %22 = tpu.matmul %19, %21, %cst_18 {dimension_numbers = #tpu.dot_dimension_numbers<[1], [0], [0], [1], [0, 0, 1, 1], [], []>} : vector<32x128xf32>, vector<128x32xf32>, vector<32x32xf32> -> vector<32x32xf32>
    %23 = arith.addf %18, %22 : vector<32x32xf32>
    %24 = vector.extract_strided_slice %6 {offsets = [96, 0], sizes = [32, 128], strides = [1, 1]} : vector<288x128xf32> to vector<32x128xf32>
    %c3 = arith.constant 3 : index
    %c0_19 = arith.constant 0 : index
    %c0_20 = arith.constant 0 : index
    %25 = vector.load %arg3[%c3, %c0_19, %c0_20] : memref<9x128x32xf32, #tpu.memory_space<vmem>>, vector<1x128x32xf32>
    %26 = vector.shape_cast %25 : vector<1x128x32xf32> to vector<128x32xf32>
    %cst_21 = arith.constant dense<0.000000e+00> : vector<32x32xf32>
    %27 = tpu.matmul %24, %26, %cst_21 {dimension_numbers = #tpu.dot_dimension_numbers<[1], [0], [0], [1], [0, 0, 1, 1], [], []>} : vector<32x128xf32>, vector<128x32xf32>, vector<32x32xf32> -> vector<32x32xf32>
    %28 = arith.addf %23, %27 : vector<32x32xf32>
    %29 = vector.extract_strided_slice %6 {offsets = [128, 0], sizes = [32, 128], strides = [1, 1]} : vector<288x128xf32> to vector<32x128xf32>
    %c4 = arith.constant 4 : index
    %c0_22 = arith.constant 0 : index
    %c0_23 = arith.constant 0 : index
    %30 = vector.load %arg3[%c4, %c0_22, %c0_23] : memref<9x128x32xf32, #tpu.memory_space<vmem>>, vector<1x128x32xf32>
    %31 = vector.shape_cast %30 : vector<1x128x32xf32> to vector<128x32xf32>
    %cst_24 = arith.constant dense<0.000000e+00> : vector<32x32xf32>
    %32 = tpu.matmul %29, %31, %cst_24 {dimension_numbers = #tpu.dot_dimension_numbers<[1], [0], [0], [1], [0, 0, 1, 1], [], []>} : vector<32x128xf32>, vector<128x32xf32>, vector<32x32xf32> -> vector<32x32xf32>
    %33 = arith.addf %28, %32 : vector<32x32xf32>
    %34 = vector.extract_strided_slice %6 {offsets = [160, 0], sizes = [32, 128], strides = [1, 1]} : vector<288x128xf32> to vector<32x128xf32>
    %c5 = arith.constant 5 : index
    %c0_25 = arith.constant 0 : index
    %c0_26 = arith.constant 0 : index
    %35 = vector.load %arg3[%c5, %c0_25, %c0_26] : memref<9x128x32xf32, #tpu.memory_space<vmem>>, vector<1x128x32xf32>
    %36 = vector.shape_cast %35 : vector<1x128x32xf32> to vector<128x32xf32>
    %cst_27 = arith.constant dense<0.000000e+00> : vector<32x32xf32>
    %37 = tpu.matmul %34, %36, %cst_27 {dimension_numbers = #tpu.dot_dimension_numbers<[1], [0], [0], [1], [0, 0, 1, 1], [], []>} : vector<32x128xf32>, vector<128x32xf32>, vector<32x32xf32> -> vector<32x32xf32>
    %38 = arith.addf %33, %37 : vector<32x32xf32>
    %39 = vector.extract_strided_slice %6 {offsets = [192, 0], sizes = [32, 128], strides = [1, 1]} : vector<288x128xf32> to vector<32x128xf32>
    %c6 = arith.constant 6 : index
    %c0_28 = arith.constant 0 : index
    %c0_29 = arith.constant 0 : index
    %40 = vector.load %arg3[%c6, %c0_28, %c0_29] : memref<9x128x32xf32, #tpu.memory_space<vmem>>, vector<1x128x32xf32>
    %41 = vector.shape_cast %40 : vector<1x128x32xf32> to vector<128x32xf32>
    %cst_30 = arith.constant dense<0.000000e+00> : vector<32x32xf32>
    %42 = tpu.matmul %39, %41, %cst_30 {dimension_numbers = #tpu.dot_dimension_numbers<[1], [0], [0], [1], [0, 0, 1, 1], [], []>} : vector<32x128xf32>, vector<128x32xf32>, vector<32x32xf32> -> vector<32x32xf32>
    %43 = arith.addf %38, %42 : vector<32x32xf32>
    %44 = vector.extract_strided_slice %6 {offsets = [224, 0], sizes = [32, 128], strides = [1, 1]} : vector<288x128xf32> to vector<32x128xf32>
    %c7 = arith.constant 7 : index
    %c0_31 = arith.constant 0 : index
    %c0_32 = arith.constant 0 : index
    %45 = vector.load %arg3[%c7, %c0_31, %c0_32] : memref<9x128x32xf32, #tpu.memory_space<vmem>>, vector<1x128x32xf32>
    %46 = vector.shape_cast %45 : vector<1x128x32xf32> to vector<128x32xf32>
    %cst_33 = arith.constant dense<0.000000e+00> : vector<32x32xf32>
    %47 = tpu.matmul %44, %46, %cst_33 {dimension_numbers = #tpu.dot_dimension_numbers<[1], [0], [0], [1], [0, 0, 1, 1], [], []>} : vector<32x128xf32>, vector<128x32xf32>, vector<32x32xf32> -> vector<32x32xf32>
    %48 = arith.addf %43, %47 : vector<32x32xf32>
    %49 = vector.extract_strided_slice %6 {offsets = [256, 0], sizes = [32, 128], strides = [1, 1]} : vector<288x128xf32> to vector<32x128xf32>
    %c8 = arith.constant 8 : index
    %c0_34 = arith.constant 0 : index
    %c0_35 = arith.constant 0 : index
    %50 = vector.load %arg3[%c8, %c0_34, %c0_35] : memref<9x128x32xf32, #tpu.memory_space<vmem>>, vector<1x128x32xf32>
    %51 = vector.shape_cast %50 : vector<1x128x32xf32> to vector<128x32xf32>
    %cst_36 = arith.constant dense<0.000000e+00> : vector<32x32xf32>
    %52 = tpu.matmul %49, %51, %cst_36 {dimension_numbers = #tpu.dot_dimension_numbers<[1], [0], [0], [1], [0, 0, 1, 1], [], []>} : vector<32x128xf32>, vector<128x32xf32>, vector<32x32xf32> -> vector<32x32xf32>
    %53 = arith.addf %48, %52 : vector<32x32xf32>
    %cst_37 = arith.constant 0.000000e+00 : f32
    %54 = vector.broadcast %cst_37 : f32 to vector<32x32xf32>
    %55 = arith.maximumf %53, %54 : vector<32x32xf32>
    %c0_38 = arith.constant 0 : index
    %c0_39 = arith.constant 0 : index
    %56 = vector.load %arg6[%c0_38, %c0_39] : memref<5x32xf32, #tpu.memory_space<vmem>>, vector<5x32xf32>
    %cst_40 = arith.constant dense<0.000000e+00> : vector<5x32xf32>
    %57 = tpu.matmul %56, %55, %cst_40 {dimension_numbers = #tpu.dot_dimension_numbers<[1], [0], [0], [1], [0, 0, 1, 1], [], []>} : vector<5x32xf32>, vector<32x32xf32>, vector<5x32xf32> -> vector<5x32xf32>
    %c0_41 = arith.constant 0 : index
    %c0_42 = arith.constant 0 : index
    %58 = vector.load %arg7[%c0_41, %c0_42] : memref<5x1xf32, #tpu.memory_space<vmem>>, vector<5x1xf32>
    %59 = vector.broadcast %58 : vector<5x1xf32> to vector<5x32xf32>
    %60 = arith.addf %57, %59 : vector<5x32xf32>
    %c0_43 = arith.constant 0 : index
    %c0_44 = arith.constant 0 : index
    %61 = vector.load %arg8[%c0_43, %c0_44] : memref<32x512xf32, #tpu.memory_space<vmem>>, vector<32x512xf32>
    %cst_45 = arith.constant dense<0.000000e+00> : vector<5x512xf32>
    %62 = tpu.matmul %60, %61, %cst_45 {dimension_numbers = #tpu.dot_dimension_numbers<[1], [0], [0], [1], [0, 0, 1, 1], [], []>} : vector<5x32xf32>, vector<32x512xf32>, vector<5x512xf32> -> vector<5x512xf32>
    %c0_46 = arith.constant 0 : index
    %c0_47 = arith.constant 0 : index
    %63 = vector.load %arg9[%c0_46, %c0_47] : memref<5x512xf32, #tpu.memory_space<vmem>>, vector<5x512xf32>
    tpu.vector_store %arg9[%c0_46, %c0_47], %62 {strides = array<i32>} : memref<5x512xf32, #tpu.memory_space<vmem>>, vector<5x512xf32>,
    return
  }
  func.func @transform_0(%arg0: i32) -> (i32, i32) {
    %c0_i32 = arith.constant 0 : i32
    %c0_i32_0 = arith.constant 0 : i32
    %c0_i32_1 = arith.constant 0 : i32
    return %c0_i32, %c0_i32_0 : i32, i32
  }
  func.func @transform_1(%arg0: i32) -> (i32, i32) {
    %c0_i32 = arith.constant 0 : i32
    %c0_i32_0 = arith.constant 0 : i32
    %c0_i32_1 = arith.constant 0 : i32
    return %c0_i32, %c0_i32_0 : i32, i32
  }
  func.func @transform_2(%arg0: i32) -> (i32, i32, i32) {
    %c0_i32 = arith.constant 0 : i32
    %c0_i32_0 = arith.constant 0 : i32
    %c0_i32_1 = arith.constant 0 : i32
    %c0_i32_2 = arith.constant 0 : i32
    return %c0_i32, %c0_i32_0, %c0_i32_1 : i32, i32, i32
  }
  func.func @transform_3(%arg0: i32) -> (i32, i32) {
    %c0_i32 = arith.constant 0 : i32
    %c0_i32_0 = arith.constant 0 : i32
    %c0_i32_1 = arith.constant 0 : i32
    return %c0_i32, %c0_i32_0 : i32, i32
  }
  func.func @transform_4(%arg0: i32) -> (i32, i32) {
    %c0_i32 = arith.constant 0 : i32
    %c0_i32_0 = arith.constant 0 : i32
    %c0_i32_1 = arith.constant 0 : i32
    return %c0_i32, %c0_i32_0 : i32, i32
  }
  func.func @transform_5(%arg0: i32) -> (i32, i32) {
    %c0_i32 = arith.constant 0 : i32
    %c0_i32_0 = arith.constant 0 : i32
    %c0_i32_1 = arith.constant 0 : i32
    return %c0_i32, %c0_i32_0 : i32, i32
  }
  func.func @transform_6(%arg0: i32) -> (i32, i32) {
    %c0_i32 = arith.constant 0 : i32
    %c0_i32_0 = arith.constant 0 : i32
    %c0_i32_1 = arith.constant 0 : i32
    return %c0_i32, %c0_i32_0 : i32, i32
  }
  func.func @transform_7(%arg0: i32) -> (i32, i32) {
    %c0_i32 = arith.constant 0 : i32
    %c0_i32_0 = arith.constant 0 : i32
    %c0_i32_1 = arith.constant 0 : i32
    return %c0_i32, %c0_i32_0 : i32, i32
  }
  func.func @transform_8(%arg0: i32) -> (i32, i32) {
    %c0_i32 = arith.constant 0 : i32
    %c0_i32_0 = arith.constant 0 : i32
    %c0_i32_1 = arith.constant 0 : i32
    return %c0_i32, %c0_i32_0 : i32, i32
  }
}

</mosaic_0001>

<bundles_post_ra>
// kernel: tpu_custom_call.1
= control target key start
LH: loop header
LB: loop body
LE: loop exit
PB: predicated region body
PF: predicated region fallthrough
CT: control target
= control target key end

     0   :  { %vm39_vm0 = vcmask 302080   ;;  %s3828_s0 = inlined_call_operand.vmem [shape: f32[37,128], index: 0, kind: input, shape index: {}]   ;;  %s3829_s1 = inlined_call_operand.vmem [shape: f32[32,37], index: 1, kind: input, shape index: {}]   ;;  %s3830_s2 = inlined_call_operand.vmem [shape: f32[9,128,32], index: 2, kind: input, shape index: {}]   ;;  %s3831_s3 = inlined_call_operand.vmem [shape: f32[288,32], index: 3, kind: input, shape index: {}]   ;;  %s3832_s4 = inlined_call_operand.vmem [shape: f32[32,1], index: 4, kind: input, shape index: {}]   ;;  %s3833_s5 = inlined_call_operand.vmem [shape: f32[5,32], index: 5, kind: input, shape index: {}]   ;;  %s3834_s6 = inlined_call_operand.vmem [shape: f32[5,1], index: 6, kind: input, shape index: {}]   ;;  %s3835_s7 = inlined_call_operand.vmem [shape: f32[32,512], index: 7, kind: input, shape index: {}]   ;;  %s3836_s8 = inlined_call_operand.hbm [shape: f32[5,512], index: 8, kind: output, shape index: {}]  }
   0x1   :  { %v34_v0 = vld [vmem:[%s3828_s0] sm:$0xff]  ;;  %v35_v1 = vld [vmem:[%s3828_s0 + $0x8] sm:$0xff]  ;;  %v36_v2 = vld [vmem:[%s3828_s0 + $0x10] sm:$0xff] }
   0x2   :  { %v2612_v3 = vpack.c.bf16 %v35_v1, %v34_v0  ;;  %v37_v4 = vld [vmem:[%s3828_s0 + $0x18] sm:$0xff]  ;;  %v30_v5 = vld [vmem:[%s3829_s1] sm:$0xff] }
   0x3   :  { %v2616_v6 = vpack.c.bf16 %v37_v4, %v36_v2  ;;  %2191 = vmatprep.mubr.msk.f32.mxu1 %vm39_vm0, %v30_v5 }
   0x4   :  { %2613 = vmatprep.subr.bf16.mxu1 %v2612_v3 }
   0x5   :  { %13 = vsyncpa [#allocation3], 0  ;;  %2615 = vmatpush3.bf16.msra.mxu1 %v2612_v3  ;;  %v38_v7 = vld [vmem:[%s3828_s0 + $0x20] sm:$0x1f]  ;;  %vm52_vm1 = vcmask 1044480   ;;  %v31_v8 = vld [vmem:[%s3829_s1 + $0x8] sm:$0xff] }
   0x6   :  { %2617 = vmatprep.subr.bf16.mxu1 %v2616_v6  ;;  %v32_v9 = vld [vmem:[%s3829_s1 + $0x10] sm:$0xff]  ;;  %v33_v10 = vld [vmem:[%s3829_s1 + $0x18] sm:$0xff]  ;;  %v145_v11 = vld [vmem:[%s3831_s3] sm:$0xff]  ;;  %vm181_vm2 = vcmask 261120   ;;  %vm3007_vm3 = vmmov 0   ;;  %s3009_s15 = smov [#allocation2]  }
   0x7   :  { %v1848_v12 = vld [vmem:[%s3830_s2 + $0x180] sm:$0xff]  ;;  %v1849_v13 = vld [vmem:[%s3830_s2 + $0x188] sm:$0xff]  ;;  %v1850_v15 = vld [vmem:[%s3830_s2 + $0x190] sm:$0xff]  ;;  %s1767_s16 = sshll.u32 %s3009_s15, 4  ;;  %s1768_s16 = int_to_ptr.vmem [resolvable:$true] %s1767_s16 }
   0x8   :  { %v2724_v14 = vpack.c.bf16 %v1849_v13, %v1848_v12  ;;  %v1851_v16 = vld [vmem:[%s3830_s2 + $0x198] sm:$0xff]  ;;  %v539_v26 = vld [vmem:[%s3830_s2] sm:$0xff]  ;;  %v540_v27 = vld [vmem:[%s3830_s2 + $0x8] sm:$0xff]  ;;  %p2986_p1 = scmp.lt.s32.totalorder %s1768_s16, %s1768_s16 }
   0x9   :  { %2619 = vmatpush3.bf16.msra.mxu1 %v2616_v6  ;;  %v2728_v17 = vpack.c.bf16 %v1851_v16, %v1850_v15  ;;  %v2628_v30 = vpack.c.bf16 %v540_v27, %v539_v26  ;;  %v541_v31 = vld [vmem:[%s3830_s2 + $0x10] sm:$0xff]  ;;  %v542_v32 = vld [vmem:[%s3830_s2 + $0x18] sm:$0xff]  ;;  %v146_v33 = vld [vmem:[%s3831_s3 + $0x8] sm:$0xff] }
   0xa   :  { %2189 = vmatprep.subr.msk.mxu1 %vm52_vm1, %v38_v7  ;;  %2725 = vmatprep.subr.bf16.mxu0 %v2724_v14  ;;  %v147_v34 = vld [vmem:[%s3831_s3 + $0x10] sm:$0xff]  ;;  %v2632_v35 = vpack.c.bf16 %v542_v32, %v541_v31  ;;  %v543_v36 = vld [vmem:[%s3830_s2 + $0x20] sm:$0xff]  ;;  %v544_v37 = vld [vmem:[%s3830_s2 + $0x28] sm:$0xff] }
   0xb   :  { %2727 = vmatpush3.bf16.msra.mxu0 %v2724_v14  ;;  %v148_v38 = vld [vmem:[%s3831_s3 + $0x18] sm:$0xff]  ;;  %v149_v39 = vld [vmem:[%s3831_s3 + $0x20] sm:$0xff]  ;;  %v2636_v40 = vpack.c.bf16 %v544_v37, %v543_v36  ;;  %v545_v41 = vld [vmem:[%s3830_s2 + $0x30] sm:$0xff] }
   0xc   :  { %2729 = vmatprep.subr.bf16.mxu0 %v2728_v17  ;;  %v546_v42 = vld [vmem:[%s3830_s2 + $0x38] sm:$0xff]  ;;  %v150_v43 = vld [vmem:[%s3831_s3 + $0x28] sm:$0xff]  ;;  %v151_v44 = vld [vmem:[%s3831_s3 + $0x30] sm:$0xff] }
   0xd   :  { %2190 = vmatpush3.msk.msra.mxu1 %vm52_vm1, %v38_v7  ;;  %v2640_v45 = vpack.c.bf16 %v546_v42, %v545_v41  ;;  %v547_v46 = vld [vmem:[%s3830_s2 + $0x40] sm:$0xff]  ;;  %v548_v47 = vld [vmem:[%s3830_s2 + $0x48] sm:$0xff]  ;;  %v152_v48 = vld [vmem:[%s3831_s3 + $0x38] sm:$0xff] }
   0xe   :  { %2192 = vmatmul.mubr.msk.f32.vlgmr.msra.gmra.mrb[0].mxu1 %vm39_vm0, %v31_v8  ;;  %v153_v49 = vld [vmem:[%s3831_s3 + $0x40] sm:$0xff]  ;;  %v2644_v50 = vpack.c.bf16 %v548_v47, %v547_v46  ;;  %v549_v51 = vld [vmem:[%s3830_s2 + $0x50] sm:$0xff]  ;;  %v550_v52 = vld [vmem:[%s3830_s2 + $0x58] sm:$0xff] }
   0xf   :  { %2194 = vmatprep.mubr.msk.f32.mxu1 %vm39_vm0, %v32_v9  ;;  %2731 = vmatpush3.bf16.msra.mxu0 %v2728_v17  ;;  %v154_v53 = vld [vmem:[%s3831_s3 + $0x48] sm:$0xff]  ;;  %v155_v54 = vld [vmem:[%s3831_s3 + $0x50] sm:$0xff]  ;;  %v2648_v55 = vpack.c.bf16 %v550_v52, %v549_v51  ;;  %v551_v56 = vld [vmem:[%s3830_s2 + $0x60] sm:$0xff] }
  0x10   :  { %v552_v57 = vld [vmem:[%s3830_s2 + $0x68] sm:$0xff]  ;;  %v156_v58 = vld [vmem:[%s3831_s3 + $0x58] sm:$0xff]  ;;  %v157_v59 = vld [vmem:[%s3831_s3 + $0x60] sm:$0xff] }
  0x11   :  { %v2652_v60 = vpack.c.bf16 %v552_v57, %v551_v56  ;;  %v553_v61 = vld [vmem:[%s3830_s2 + $0x70] sm:$0xff]  ;;  %v554_v62 = vld [vmem:[%s3830_s2 + $0x78] sm:$0xff]  ;;  %v158_v63 = vld [vmem:[%s3831_s3 + $0x68] sm:$0xff] }
  0x12   :  { %2195 = vmatmul.mubr.msk.f32.gmra.mrb[2].mxu1 %vm39_vm0, %v33_v10  ;;  %v159_v0 = vld [vmem:[%s3831_s3 + $0x70] sm:$0xff]  ;;  %v2656_v1 = vpack.c.bf16 %v554_v62, %v553_v61  ;;  %v160_v2 = vld [vmem:[%s3831_s3 + $0x78] sm:$0xff]  ;;  %v161_v3 = vld [vmem:[%s3831_s3 + $0x80] sm:$0xff] }
  0x13   :  { %2205 = vmatprep.mubr.msk.f32.mxu1 %vm181_vm2, %v145_v11  ;;  %v162_v4 = vld [vmem:[%s3831_s3 + $0x88] sm:$0xff]  ;;  %v163_v5 = vld [vmem:[%s3831_s3 + $0x90] sm:$0xff]  ;;  %v164_v6 = vld [vmem:[%s3831_s3 + $0x98] sm:$0xff] }
  0x14   :  { %v165_v7 = vld [vmem:[%s3831_s3 + $0xa0] sm:$0xff]  ;;  %v166_v8 = vld [vmem:[%s3831_s3 + $0xa8] sm:$0xff]  ;;  %v167_v9 = vld [vmem:[%s3831_s3 + $0xb0] sm:$0xff] }
  0x15   :  { %v168_v10 = vld [vmem:[%s3831_s3 + $0xb8] sm:$0xff]  ;;  %v169_v11 = vld [vmem:[%s3831_s3 + $0xc0] sm:$0xff]  ;;  %v170_v12 = vld [vmem:[%s3831_s3 + $0xc8] sm:$0xff] }
  0x16   :  { %v171_v13 = vld [vmem:[%s3831_s3 + $0xd0] sm:$0xff]  ;;  %v172_v14 = vld [vmem:[%s3831_s3 + $0xd8] sm:$0xff]  ;;  %v173_v15 = vld [vmem:[%s3831_s3 + $0xe0] sm:$0xff] }
  0x17   :  { %v174_v16 = vld [vmem:[%s3831_s3 + $0xe8] sm:$0xff]  ;;  %v175_v17 = vld [vmem:[%s3831_s3 + $0xf0] sm:$0xff]  ;;  %v1856_v32 = vld [vmem:[%s3830_s2 + $0x1c0] sm:$0xff] }
  0x18   :  { %v1853_v27 = vld [vmem:[%s3830_s2 + $0x1a8] sm:$0xff]  ;;  %v1859_v36 = vld [vmem:[%s3830_s2 + $0x1d8] sm:$0xff]  ;;  %v1862_v41 = vld [vmem:[%s3830_s2 + $0x1f0] sm:$0xff] }
  0x19   :  { %v1863_v42 = vld [vmem:[%s3830_s2 + $0x1f8] sm:$0xff]  ;;  %v1818_v47 = vld [vmem:[%s3830_s2 + $0x90] sm:$0xff]  ;;  %v1820_v52 = vld [vmem:[%s3830_s2 + $0xa0] sm:$0xff] }
  0x1a   :  { %v1822_v57 = vld [vmem:[%s3830_s2 + $0xb0] sm:$0xff]  ;;  %v1824_v62 = vld [vmem:[%s3830_s2 + $0xc0] sm:$0xff] }
  0xe1   :  { %v2193_v18 = vpop.f32.mrb[0].mxu1 }
  0xe2   :  { %v142_v19 = vmax.f32 %v2193_v18, 0.0  ;;  %v122_v20 = vpop.f32.mrb[1].mxu1  ;;  %v176_v18 = vld [vmem:[%s3831_s3 + $0xf8] sm:$0xff] }
  0xe3   :  { %v141_v21 = vmax.f32 %v122_v20, 0.0  ;;  %v178_v20 = vld [vmem:[%s3831_s3 + $0x108] sm:$0xff] }
  0xe5   :  { %v2620_v22 = vpack.c.bf16 %v142_v19, %v141_v21  ;;  %v2196_v23 = vpop.f32.mrb[2].mxu1  ;;  %v177_v19 = vld [vmem:[%s3831_s3 + $0x100] sm:$0xff]  ;;  %v179_v21 = vld [vmem:[%s3831_s3 + $0x110] sm:$0xff] }
  0xe6   :  { %v144_v24 = vmax.f32 %v2196_v23, 0.0  ;;  %v132_v25 = vpop.f32.mrb[3].mxu1  ;;  %v1816_v23 = vld [vmem:[%s3830_s2 + $0x80] sm:$0xff] }
  0xe7   :  { %v143_v28 = vmax.f32 %v132_v25, 0.0  ;;  %2621 = vmatprep.subr.bf16.mxu1 %v2620_v22  ;;  %v1852_v25 = vld [vmem:[%s3830_s2 + $0x1a0] sm:$0xff] }
  0xe8   :  { %2623 = vmatpush3.bf16.msra.mxu1 %v2620_v22  ;;  %v180_v22 = vld [vmem:[%s3831_s3 + $0x118] sm:$0xff] }
  0xe9   :  { %v2624_v29 = vpack.c.bf16 %v144_v24, %v143_v28  ;;  %v1817_v24 = vld [vmem:[%s3830_s2 + $0x88] sm:$0xff]  ;;  %v2732_v28 = vpack.c.bf16 %v1853_v27, %v1852_v25  ;;  %v1832_v25 = vld [vmem:[%s3830_s2 + $0x100] sm:$0xff] }
  0xea   :  { %v2660_v26 = vpack.c.bf16 %v1817_v24, %v1816_v23  ;;  %v1833_v27 = vld [vmem:[%s3830_s2 + $0x108] sm:$0xff] }
  0xeb   :  { %2625 = vmatprep.subr.bf16.mxu1 %v2624_v29  ;;  %2733 = vmatprep.subr.bf16.mxu0 %v2732_v28 }
  0xec   :  { %2627 = vmatpush3.bf16.msra.mxu1 %v2624_v29  ;;  %2735 = vmatpush3.bf16.msra.mxu0 %v2732_v28  ;;  %v1854_v29 = vld [vmem:[%s3830_s2 + $0x1b0] sm:$0xff]  ;;  %v1868_v28 = vld [vmem:[%s3830_s2 + $0x220] sm:$0xff] }
  0xed   :  { %2629 = vmatprep.subr.bf16.mxu1 %v2628_v30 }
  0xef   :  { %2206 = vmatmul.mubr.msk.f32.vlgmr.msra.gmra.mrb[4].mxu1 %vm181_vm2, %v146_v33  ;;  %v1857_v33 = vld [vmem:[%s3830_s2 + $0x1c8] sm:$0xff] }
  0xf0   :  { %2208 = vmatprep.mubr.msk.f32.mxu1 %vm181_vm2, %v147_v34  ;;  %2631 = vmatpush3.bf16.msra.mxu1 %v2628_v30  ;;  %v1855_v30 = vld [vmem:[%s3830_s2 + $0x1b8] sm:$0xff]  ;;  %v2740_v34 = vpack.c.bf16 %v1857_v33, %v1856_v32 }
  0xf1   :  { %2633 = vmatprep.subr.bf16.mxu1 %v2632_v35  ;;  %v2736_v31 = vpack.c.bf16 %v1855_v30, %v1854_v29  ;;  %v1869_v29 = vld [vmem:[%s3830_s2 + $0x228] sm:$0xff] }
  0xf2   :  { %v2764_v32 = vpack.c.bf16 %v1869_v29, %v1868_v28  ;;  %v1884_v29 = vld [vmem:[%s3830_s2 + $0x2a0] sm:$0xff] }
  0xf3   :  { %2209 = vmatmul.mubr.msk.f32.gmra.mrb[6].mxu1 %vm181_vm2, %v148_v38  ;;  %2737 = vmatprep.subr.bf16.mxu0 %v2736_v31  ;;  %v1860_v38 = vld [vmem:[%s3830_s2 + $0x1e0] sm:$0xff] }
  0xf4   :  { %2211 = vmatprep.mubr.msk.f32.mxu1 %vm181_vm2, %v149_v39  ;;  %2635 = vmatpush3.bf16.msra.mxu1 %v2632_v35  ;;  %v1858_v35 = vld [vmem:[%s3830_s2 + $0x1d0] sm:$0xff]  ;;  %v1861_v39 = vld [vmem:[%s3830_s2 + $0x1e8] sm:$0xff] }
  0xf5   :  { %2637 = vmatprep.subr.bf16.mxu1 %v2636_v40  ;;  %2739 = vmatpush3.bf16.msra.mxu0 %v2736_v31  ;;  %v2744_v37 = vpack.c.bf16 %v1859_v36, %v1858_v35  ;;  %v2692_v31 = vpack.c.bf16 %v1833_v27, %v1832_v25  ;;  %v1835_v35 = vld [vmem:[%s3830_s2 + $0x118] sm:$0xff]  ;;  %v1870_v36 = vld [vmem:[%s3830_s2 + $0x230] sm:$0xff] }
  0xf6   :  { %2741 = vmatprep.subr.bf16.mxu0 %v2740_v34 }
  0xf7   :  { %2212 = vmatmul.mubr.msk.f32.gmra.mrb[8].mxu1 %vm181_vm2, %v150_v43  ;;  %v2752_v43 = vpack.c.bf16 %v1863_v42, %v1862_v41  ;;  %v1836_v42 = vld [vmem:[%s3830_s2 + $0x120] sm:$0xff] }
  0xf8   :  { %2214 = vmatprep.mubr.msk.f32.mxu1 %vm181_vm2, %v151_v44  ;;  %2639 = vmatpush3.bf16.msra.mxu1 %v2636_v40  ;;  %v2748_v40 = vpack.c.bf16 %v1861_v39, %v1860_v38  ;;  %v1864_v44 = vld [vmem:[%s3830_s2 + $0x200] sm:$0xff] }
  0xf9   :  { %2641 = vmatprep.subr.bf16.mxu1 %v2640_v45  ;;  %2743 = vmatpush3.bf16.msra.mxu0 %v2740_v34  ;;  %v1834_v34 = vld [vmem:[%s3830_s2 + $0x110] sm:$0xff] }
  0xfa   :  { %2745 = vmatprep.subr.bf16.mxu0 %v2744_v37  ;;  %v2696_v39 = vpack.c.bf16 %v1835_v35, %v1834_v34  ;;  %v1886_v34 = vld [vmem:[%s3830_s2 + $0x2b0] sm:$0xff]  ;;  %v1887_v35 = vld [vmem:[%s3830_s2 + $0x2b8] sm:$0xff] }
  0xfb   :  { %2215 = vmatmul.mubr.msk.f32.gmra.mrb[10].mxu1 %vm181_vm2, %v152_v48  ;;  %v1819_v48 = vld [vmem:[%s3830_s2 + $0x98] sm:$0xff] }
  0xfc   :  { %2217 = vmatprep.mubr.msk.f32.mxu1 %vm181_vm2, %v153_v49  ;;  %2643 = vmatpush3.bf16.msra.mxu1 %v2640_v45  ;;  %v1865_v45 = vld [vmem:[%s3830_s2 + $0x208] sm:$0xff]  ;;  %v2664_v51 = vpack.c.bf16 %v1819_v48, %v1818_v47 }
  0xfd   :  { %2645 = vmatprep.subr.bf16.mxu1 %v2644_v50  ;;  %2747 = vmatpush3.bf16.msra.mxu0 %v2744_v37  ;;  %v3338_v46 = vpack.c.bf16 %v1865_v45, %v1864_v44  ;;  %v1871_v37 = vld [vmem:[%s3830_s2 + $0x238] sm:$0xff]  ;;  %v1872_v44 = vld [vmem:[%s3830_s2 + $0x240] sm:$0xff]  ;;  %v1873_v45 = vld [vmem:[%s3830_s2 + $0x248] sm:$0xff] }
  0xfe   :  { %2749 = vmatprep.subr.bf16.mxu0 %v2748_v40  ;;  %v2768_v41 = vpack.c.bf16 %v1871_v37, %v1870_v36  ;;  %v1517_v37 = vld [vmem:[%s3834_s6] sm:$0x1f] }
  0xff   :  { %2218 = vmatmul.mubr.msk.f32.gmra.mrb[12].mxu1 %vm181_vm2, %v154_v53  ;;  %v1821_v53 = vld [vmem:[%s3830_s2 + $0xa8] sm:$0xff] }
 0x100   :  { %2220 = vmatprep.mubr.msk.f32.mxu1 %vm181_vm2, %v155_v54  ;;  %2647 = vmatpush3.bf16.msra.mxu1 %v2644_v50  ;;  %v2668_v56 = vpack.c.bf16 %v1821_v53, %v1820_v52  ;;  %v1874_v52 = vld [vmem:[%s3830_s2 + $0x250] sm:$0xff]  ;;  %v1875_v53 = vld [vmem:[%s3830_s2 + $0x258] sm:$0xff] }
 0x101   :  { %2649 = vmatprep.subr.bf16.mxu1 %v2648_v55  ;;  %2751 = vmatpush3.bf16.msra.mxu0 %v2748_v40 }
 0x102   :  { %2753 = vmatprep.subr.bf16.mxu0 %v2752_v43 }
 0x103   :  { %2221 = vmatmul.mubr.msk.f32.gmra.mrb[14].mxu1 %vm181_vm2, %v156_v58  ;;  %v1823_v58 = vld [vmem:[%s3830_s2 + $0xb8] sm:$0xff] }
 0x104   :  { %2223 = vmatprep.mubr.msk.f32.mxu1 %vm181_vm2, %v157_v59  ;;  %2651 = vmatpush3.bf16.msra.mxu1 %v2648_v55  ;;  %v2672_v61 = vpack.c.bf16 %v1823_v58, %v1822_v57  ;;  %v2776_v57 = vpack.c.bf16 %v1875_v53, %v1874_v52  ;;  %v1840_v58 = vld [vmem:[%s3830_s2 + $0x140] sm:$0xff]  ;;  %v1897_v52 = vld [vmem:[%s3830_s2 + $0x308] sm:$0xff] }
 0x105   :  { %2653 = vmatprep.subr.bf16.mxu1 %v2652_v60  ;;  %2755 = vmatpush3.bf16.msra.mxu0 %v2752_v43  ;;  %v1837_v43 = vld [vmem:[%s3830_s2 + $0x128] sm:$0xff] }
 0x106   :  { %2757 = vmatprep.subr.bf16.mxu0 %v3338_v46  ;;  %v2700_v47 = vpack.c.bf16 %v1837_v43, %v1836_v42 }
 0x107   :  { %2224 = vmatmul.mubr.msk.f32.gmra.mrb[16].mxu1 %vm181_vm2, %v158_v63  ;;  %v1825_v63 = vld [vmem:[%s3830_s2 + $0xc8] sm:$0xff] }
 0x108   :  { %2226 = vmatprep.mubr.msk.f32.mxu1 %vm181_vm2, %v159_v0  ;;  %2655 = vmatpush3.bf16.msra.mxu1 %v2652_v60 }
 0x109   :  { %2657 = vmatprep.subr.bf16.mxu1 %v2656_v1 }
 0x10b   :  { %2227 = vmatmul.mubr.msk.f32.gmra.mrb[18].mxu1 %vm181_vm2, %v160_v2  ;;  %v2676_v2 = vpack.c.bf16 %v1825_v63, %v1824_v62 }
 0x10c   :  { %2229 = vmatprep.mubr.msk.f32.mxu1 %vm181_vm2, %v161_v3  ;;  %2659 = vmatpush3.bf16.msra.mxu1 %v2656_v1  ;;  %v1826_v3 = vld [vmem:[%s3830_s2 + $0xd0] sm:$0xff] }
 0x10d   :  { %2661 = vmatprep.subr.bf16.mxu1 %v2660_v26 }
 0x10f   :  { %2230 = vmatmul.mubr.msk.f32.gmra.mrb[20].mxu1 %vm181_vm2, %v162_v4  ;;  %v1827_v4 = vld [vmem:[%s3830_s2 + $0xd8] sm:$0xff] }
 0x110   :  { %2232 = vmatprep.mubr.msk.f32.mxu1 %vm181_vm2, %v163_v5 }
 0x113   :  { %2233 = vmatmul.mubr.msk.f32.gmra.mrb[22].mxu1 %vm181_vm2, %v164_v6 }
 0x114   :  { %2235 = vmatprep.mubr.msk.f32.mxu1 %vm181_vm2, %v165_v7  ;;  %v2680_v7 = vpack.c.bf16 %v1827_v4, %v1826_v3  ;;  %v1843_v3 = vld [vmem:[%s3830_s2 + $0x158] sm:$0xff]  ;;  %v1878_v4 = vld [vmem:[%s3830_s2 + $0x270] sm:$0xff] }
 0x117   :  { %2236 = vmatmul.mubr.msk.f32.gmra.mrb[24].mxu1 %vm181_vm2, %v166_v8  ;;  %v535_v8 = vld [vmem:[%s3832_s4] sm:$0xff] }
 0x118   :  { %2238 = vmatprep.mubr.msk.f32.mxu1 %vm181_vm2, %v167_v9  ;;  %v1828_v9 = vld [vmem:[%s3830_s2 + $0xe0] sm:$0xff] }
 0x11b   :  { %2239 = vmatmul.mubr.msk.f32.gmra.mrb[26].mxu1 %vm181_vm2, %v168_v10  ;;  %v1829_v10 = vld [vmem:[%s3830_s2 + $0xe8] sm:$0xff] }
 0x11c   :  { %2241 = vmatprep.mubr.msk.f32.mxu1 %vm181_vm2, %v169_v11  ;;  %v3005_v11 = vmov 0  }
 0x11d   :  { %2979 = vset.pattern.permute.xlu0 %v3005_v11  ;;  %2980 = vset.pattern.permute.xlu1 %v3005_v11  ;;  %v1844_v11 = vld [vmem:[%s3830_s2 + $0x160] sm:$0xff] }
 0x11e   :  { %642 = vperm.xlu0 %2979, %v535_v8  }
 0x11f   :  { %2242 = vmatmul.mubr.msk.f32.gmra.mrb[28].mxu1 %vm181_vm2, %v170_v12 }
 0x120   :  { %2244 = vmatprep.mubr.msk.f32.mxu1 %vm181_vm2, %v171_v13 }
 0x123   :  { %2245 = vmatmul.mubr.msk.f32.gmra.mrb[30].mxu1 %vm181_vm2, %v172_v14  ;;  %v2684_v14 = vpack.c.bf16 %v1829_v10, %v1828_v9 }
 0x124   :  { %2247 = vmatprep.mubr.msk.f32.mxu1 %vm181_vm2, %v173_v15  ;;  %v1830_v15 = vld [vmem:[%s3830_s2 + $0xf0] sm:$0xff] }
 0x127   :  { %2248 = vmatmul.mubr.msk.f32.gmra.mrb[32].mxu1 %vm181_vm2, %v174_v16  ;;  %v537_v16 = vld [vmem:[%s3832_s4 + $0x10] sm:$0xff] }
 0x128   :  { %2250 = vmatprep.mubr.msk.f32.mxu1 %vm181_vm2, %v175_v17  ;;  %v536_v17 = vld [vmem:[%s3832_s4 + $0x8] sm:$0xff]  ;;  %652 = vperm.xlu1 %2980, %v537_v16  }
 0x129   :  { %647 = vperm.xlu0 %2979, %v536_v17   ;;  %v1881_v16 = vld [vmem:[%s3830_s2 + $0x288] sm:$0xff] }
 0x12b   :  { %2251 = vmatmul.mubr.msk.f32.gmra.mrb[34].mxu1 %vm181_vm2, %v176_v18  ;;  %v1831_v18 = vld [vmem:[%s3830_s2 + $0xf8] sm:$0xff] }
 0x12c   :  { %2253 = vmatprep.mubr.msk.f32.mxu1 %vm181_vm2, %v177_v19  ;;  %v1866_v19 = vld [vmem:[%s3830_s2 + $0x210] sm:$0xff]  ;;  %v2688_v23 = vpack.c.bf16 %v1831_v18, %v1830_v15  ;;  %v1880_v15 = vld [vmem:[%s3830_s2 + $0x280] sm:$0xff] }
 0x12d   :  { %1520 = vperm.xlu0 %2979, %v1517_v37   ;;  %v1925_v37 = vld [vmem:[%s3830_s2 + $0x3e8] sm:$0xff] }
 0x12f   :  { %2254 = vmatmul.mubr.msk.f32.gmra.mrb[36].mxu1 %vm181_vm2, %v178_v20  ;;  %v1867_v20 = vld [vmem:[%s3830_s2 + $0x218] sm:$0xff] }
 0x130   :  { %2256 = vmatprep.mubr.msk.f32.mxu1 %vm181_vm2, %v179_v21  ;;  %v2760_v24 = vpack.c.bf16 %v1867_v20, %v1866_v19  ;;  %v2788_v20 = vpack.c.bf16 %v1881_v16, %v1880_v15  ;;  %v1912_v15 = vld [vmem:[%s3830_s2 + $0x380] sm:$0xff]  ;;  %v1913_v16 = vld [vmem:[%s3830_s2 + $0x388] sm:$0xff] }
 0x133   :  { %2257 = vmatmul.mubr.msk.f32.gmra.mrb[38].mxu1 %vm181_vm2, %v180_v22 }
 0x1c2   :  { %v2207_v49 = vpop.f32.mrb[4].mxu1 }
 0x1c3   :  { %v356_v50 = vpop.f32.mrb[5].mxu1 }
 0x1c4   :  { %2291 = vmatprep.mubr.f32.mxu1 %v356_v50  ;;  %v1838_v50 = vld [vmem:[%s3830_s2 + $0x130] sm:$0xff] }
 0x1c5   :  { %2292 = vmatmul.mubr.f32.vlgmr.msra.gmra.mrb[40].mxu1 %v2207_v49  ;;  %v2772_v49 = vpack.c.bf16 %v1873_v45, %v1872_v44  ;;  %v1891_v45 = vld [vmem:[%s3830_s2 + $0x2d8] sm:$0xff] }
 0x1c6   :  { %2663 = vmatpush3.bf16.msra.mxu1 %v2660_v26  ;;  %v2210_v54 = vpop.f32.mrb[6].mxu1  ;;  %v538_v26 = vld [vmem:[%s3832_s4 + $0x18] sm:$0xff] }
 0x1c7   :  { %v366_v55 = vpop.f32.mrb[7].mxu1  ;;  %2665 = vmatprep.subr.bf16.mxu1 %v2664_v51  ;;  %657 = vperm.xlu1 %2980, %v538_v26  }
 0x1c8   :  { %2294 = vmatprep.mubr.f32.mxu1 %v366_v55 }
 0x1c9   :  { %2295 = vmatmul.mubr.f32.gmra.mrb[42].mxu1 %v2210_v54 }
 0x1ca   :  { %2667 = vmatpush3.bf16.msra.mxu1 %v2664_v51  ;;  %v3359_v59 = vpop.f32.mrb[8].mxu1  ;;  %v1839_v51 = vld [vmem:[%s3830_s2 + $0x138] sm:$0xff] }
 0x1cb   :  { %v376_v60 = vpop.f32.mrb[9].mxu1  ;;  %2669 = vmatprep.subr.bf16.mxu1 %v2668_v56  ;;  %v2704_v55 = vpack.c.bf16 %v1839_v51, %v1838_v50  ;;  %v1896_v51 = vld [vmem:[%s3830_s2 + $0x300] sm:$0xff] }
 0x1cc   :  { %2329 = vmatprep.mubr.f32.mxu1 %v376_v60  ;;  %v1876_v60 = vld [vmem:[%s3830_s2 + $0x260] sm:$0xff]  ;;  %v2820_v53 = vpack.c.bf16 %v1897_v52, %v1896_v51  ;;  %v1934_v51 = vld [vmem:[%s3830_s2 + $0x430] sm:$0xff]  ;;  %v1935_v52 = vld [vmem:[%s3830_s2 + $0x438] sm:$0xff] }
 0x1ce   :  { %2671 = vmatpush3.bf16.msra.mxu1 %v2668_v56  ;;  %v3367_v0 = vpop.f32.mrb[10].mxu1 }
 0x1cf   :  { %v3369_v1 = vpop.f32.mrb[11].mxu1  ;;  %2673 = vmatprep.subr.bf16.mxu1 %v2672_v61 }
 0x1d2   :  { %2675 = vmatpush3.bf16.msra.mxu1 %v2672_v61  ;;  %v3377_v5 = vpop.f32.mrb[12].mxu1  ;;  %v1877_v61 = vld [vmem:[%s3830_s2 + $0x268] sm:$0xff] }
 0x1d3   :  { %v3379_v6 = vpop.f32.mrb[13].mxu1  ;;  %2677 = vmatprep.subr.bf16.mxu1 %v2676_v2 }
 0x1d6   :  { %2679 = vmatpush3.bf16.msra.mxu1 %v2676_v2  ;;  %v3390_v12 = vpop.f32.mrb[14].mxu1  ;;  %v1842_v2 = vld [vmem:[%s3830_s2 + $0x150] sm:$0xff] }
 0x1d7   :  { %v3392_v13 = vpop.f32.mrb[15].mxu1  ;;  %2681 = vmatprep.subr.bf16.mxu1 %v2680_v7  ;;  %v2712_v8 = vpack.c.bf16 %v1843_v3, %v1842_v2  ;;  %v1907_v3 = vld [vmem:[%s3830_s2 + $0x358] sm:$0xff] }
 0x1da   :  { %2683 = vmatpush3.bf16.msra.mxu1 %v2680_v7  ;;  %v2225_v21 = vpop.f32.mrb[16].mxu1 }
 0x1db   :  { %v416_v22 = vpop.f32.mrb[17].mxu1  ;;  %2685 = vmatprep.subr.bf16.mxu1 %v2684_v14 }
 0x1dc   :  { %2405 = vmatprep.mubr.f32.mxu0 %v416_v22  ;;  %v1847_v22 = vld [vmem:[%s3830_s2 + $0x178] sm:$0xff] }
 0x1dd   :  { %2406 = vmatmul.mubr.f32.vlgmr.msra.gmra.mrb[0].mxu0 %v2225_v21  ;;  %v1846_v21 = vld [vmem:[%s3830_s2 + $0x170] sm:$0xff] }
 0x1de   :  { %2687 = vmatpush3.bf16.msra.mxu1 %v2684_v14  ;;  %2759 = vmatpush3.bf16.msra.mxu0 %v3338_v46  ;;  %v2228_v30 = vpop.f32.mrb[18].mxu1  ;;  %v1845_v14 = vld [vmem:[%s3830_s2 + $0x168] sm:$0xff]  ;;  %v2720_v26 = vpack.c.bf16 %v1847_v22, %v1846_v21  ;;  %v1915_v21 = vld [vmem:[%s3830_s2 + $0x398] sm:$0xff] }
 0x1df   :  { %2689 = vmatprep.subr.bf16.mxu1 %v2688_v23  ;;  %2761 = vmatprep.subr.bf16.mxu0 %v2760_v24  ;;  %v426_v33 = vpop.f32.mrb[19].mxu1  ;;  %v2716_v18 = vpack.c.bf16 %v1845_v14, %v1844_v11  ;;  %v1911_v11 = vld [vmem:[%s3830_s2 + $0x378] sm:$0xff] }
 0x1e0   :  { %2408 = vmatprep.mubr.f32.mxu0 %v426_v33 }
 0x1e1   :  { %2409 = vmatmul.mubr.f32.gmra.mrb[2].mxu0 %v2228_v30  ;;  %v1885_v30 = vld [vmem:[%s3830_s2 + $0x2a8] sm:$0xff] }
 0x1e2   :  { %2691 = vmatpush3.bf16.msra.mxu1 %v2688_v23  ;;  %2763 = vmatpush3.bf16.msra.mxu0 %v2760_v24  ;;  %v3440_v38 = vpop.f32.mrb[20].mxu1  ;;  %v1882_v23 = vld [vmem:[%s3830_s2 + $0x290] sm:$0xff]  ;;  %v1883_v24 = vld [vmem:[%s3830_s2 + $0x298] sm:$0xff]  ;;  %v2796_v33 = vpack.c.bf16 %v1885_v30, %v1884_v29  ;;  %v1921_v30 = vld [vmem:[%s3830_s2 + $0x3c8] sm:$0xff] }
 0x1e3   :  { %2693 = vmatprep.subr.bf16.mxu1 %v2692_v31  ;;  %2765 = vmatprep.subr.bf16.mxu0 %v2764_v32  ;;  %v436_v40 = vpop.f32.mrb[21].mxu1  ;;  %v2792_v28 = vpack.c.bf16 %v1883_v24, %v1882_v23  ;;  %v1916_v23 = vld [vmem:[%s3830_s2 + $0x3a0] sm:$0xff]  ;;  %v1917_v24 = vld [vmem:[%s3830_s2 + $0x3a8] sm:$0xff]  ;;  %v1919_v29 = vld [vmem:[%s3830_s2 + $0x3b8] sm:$0xff] }
 0x1e4   :  { %2443 = vmatprep.mubr.f32.mxu0 %v436_v40  ;;  %v1888_v40 = vld [vmem:[%s3830_s2 + $0x2c0] sm:$0xff] }
 0x1e5   :  { %2330 = vmatmul.mubr.f32.vlgmr.msra.gmra.mrb[40].mxu1 %v3359_v59  ;;  %v1841_v59 = vld [vmem:[%s3830_s2 + $0x148] sm:$0xff] }
 0x1e6   :  { %2332 = vmatprep.mubr.f32.mxu1 %v3369_v1  ;;  %2695 = vmatpush3.bf16.msra.mxu1 %v2692_v31  ;;  %v3456_v46 = vpop.f32.mrb[22].mxu1  ;;  %v2708_v63 = vpack.c.bf16 %v1841_v59, %v1840_v58  ;;  %v2780_v1 = vpack.c.bf16 %v1877_v61, %v1876_v60  ;;  %v1900_v58 = vld [vmem:[%s3830_s2 + $0x320] sm:$0xff]  ;;  %v1901_v59 = vld [vmem:[%s3830_s2 + $0x328] sm:$0xff]  ;;  %v1902_v61 = vld [vmem:[%s3830_s2 + $0x330] sm:$0xff] }
 0x1e7   :  { %2767 = vmatpush3.bf16.msra.mxu0 %v2764_v32  ;;  %2697 = vmatprep.subr.bf16.mxu1 %v2696_v39  ;;  %v3458_v48 = vpop.f32.mrb[23].mxu1  ;;  %v2828_v60 = vpack.c.bf16 %v1901_v59, %v1900_v58  ;;  %v1941_v58 = vld [vmem:[%s3830_s2 + $0x468] sm:$0xff] }
 0x1e8   :  { %2769 = vmatprep.subr.bf16.mxu0 %v2768_v41 }
 0x1e9   :  { %2333 = vmatmul.mubr.f32.gmra.mrb[42].mxu1 %v3367_v0 }
 0x1ea   :  { %2699 = vmatpush3.bf16.msra.mxu1 %v2696_v39  ;;  %2367 = vmatprep.mubr.f32.mxu1 %v3379_v6  ;;  %v3474_v54 = vpop.f32.mrb[24].mxu1  ;;  %v1879_v6 = vld [vmem:[%s3830_s2 + $0x278] sm:$0xff]  ;;  %v2800_v39 = vpack.c.bf16 %v1887_v35, %v1886_v34  ;;  %v1924_v35 = vld [vmem:[%s3830_s2 + $0x3e0] sm:$0xff] }
 0x1eb   :  { %2771 = vmatpush3.bf16.msra.mxu0 %v2768_v41  ;;  %2701 = vmatprep.subr.bf16.mxu1 %v2700_v47  ;;  %v3476_v56 = vpop.f32.mrb[25].mxu1  ;;  %v2784_v10 = vpack.c.bf16 %v1879_v6, %v1878_v4  ;;  %v1889_v41 = vld [vmem:[%s3830_s2 + $0x2c8] sm:$0xff]  ;;  %v1908_v6 = vld [vmem:[%s3830_s2 + $0x360] sm:$0xff] }
 0x1ec   :  { %2773 = vmatprep.subr.bf16.mxu0 %v2772_v49  ;;  %v2804_v44 = vpack.c.bf16 %v1889_v41, %v1888_v40  ;;  %v1926_v40 = vld [vmem:[%s3830_s2 + $0x3f0] sm:$0xff]  ;;  %v1927_v41 = vld [vmem:[%s3830_s2 + $0x3f8] sm:$0xff] }
 0x1ee   :  { %2703 = vmatpush3.bf16.msra.mxu1 %v2700_v47  ;;  %v3490_v62 = vpop.f32.mrb[26].mxu1  ;;  %v1893_v47 = vld [vmem:[%s3830_s2 + $0x2e8] sm:$0xff] }
 0x1ef   :  { %2775 = vmatpush3.bf16.msra.mxu0 %v2772_v49  ;;  %2705 = vmatprep.subr.bf16.mxu1 %v2704_v55  ;;  %v3492_v0 = vpop.f32.mrb[27].mxu1  ;;  %v1895_v49 = vld [vmem:[%s3830_s2 + $0x2f8] sm:$0xff] }
 0x1f0   :  { %2777 = vmatprep.subr.bf16.mxu0 %v2776_v57 }
 0x1f2   :  { %2707 = vmatpush3.bf16.msra.mxu1 %v2704_v55  ;;  %v3506_v7 = vpop.f32.mrb[28].mxu1  ;;  %v1898_v55 = vld [vmem:[%s3830_s2 + $0x310] sm:$0xff] }
 0x1f3   :  { %2779 = vmatpush3.bf16.msra.mxu0 %v2776_v57  ;;  %2709 = vmatprep.subr.bf16.mxu1 %v2708_v63  ;;  %v3508_v9 = vpop.f32.mrb[29].mxu1 }
 0x1f4   :  { %2781 = vmatprep.subr.bf16.mxu0 %v2780_v1 }
 0x1f6   :  { %2711 = vmatpush3.bf16.msra.mxu1 %v2708_v63  ;;  %v3522_v17 = vpop.f32.mrb[30].mxu1  ;;  %v1903_v63 = vld [vmem:[%s3830_s2 + $0x338] sm:$0xff] }
 0x1f7   :  { %2783 = vmatpush3.bf16.msra.mxu0 %v2780_v1  ;;  %2713 = vmatprep.subr.bf16.mxu1 %v2712_v8  ;;  %v3524_v19 = vpop.f32.mrb[31].mxu1  ;;  %v1905_v1 = vld [vmem:[%s3830_s2 + $0x348] sm:$0xff] }
 0x1f8   :  { %2785 = vmatprep.subr.bf16.mxu0 %v2784_v10 }
 0x1fa   :  { %2715 = vmatpush3.bf16.msra.mxu1 %v2712_v8  ;;  %v3538_v25 = vpop.f32.mrb[32].mxu1  ;;  %v1909_v8 = vld [vmem:[%s3830_s2 + $0x368] sm:$0xff] }
 0x1fb   :  { %2787 = vmatpush3.bf16.msra.mxu0 %v2784_v10  ;;  %2717 = vmatprep.subr.bf16.mxu1 %v2716_v18  ;;  %v3540_v27 = vpop.f32.mrb[33].mxu1  ;;  %v1910_v10 = vld [vmem:[%s3830_s2 + $0x370] sm:$0xff] }
 0x1fc   :  { %2789 = vmatprep.subr.bf16.mxu0 %v2788_v20  ;;  %v2848_v14 = vpack.c.bf16 %v1911_v11, %v1910_v10 }
 0x1fe   :  { %2444 = vmatmul.mubr.f32.vlgmr.msra.gmra.mrb[0].mxu0 %v3440_v38  ;;  %2719 = vmatpush3.bf16.msra.mxu1 %v2716_v18  ;;  %v3549_v31 = vpop.f32.mrb[34].mxu1  ;;  %v2852_v18 = vpack.c.bf16 %v1913_v16, %v1912_v15 }
 0x1ff   :  { %2791 = vmatpush3.bf16.msra.mxu0 %v2788_v20  ;;  %2721 = vmatprep.subr.bf16.mxu1 %v2720_v26  ;;  %v3551_v32 = vpop.f32.mrb[35].mxu1  ;;  %v1914_v20 = vld [vmem:[%s3830_s2 + $0x390] sm:$0xff] }
 0x200   :  { %2793 = vmatprep.subr.bf16.mxu0 %v2792_v28  ;;  %2446 = vmatprep.mubr.f32.mxu0 %v3458_v48  ;;  %v1894_v48 = vld [vmem:[%s3830_s2 + $0x2f0] sm:$0xff]  ;;  %v2856_v22 = vpack.c.bf16 %v1915_v21, %v1914_v20 }
 0x201   :  { %v2816_v50 = vpack.c.bf16 %v1895_v49, %v1894_v48  ;;  %v1932_v48 = vld [vmem:[%s3830_s2 + $0x420] sm:$0xff]  ;;  %v1933_v49 = vld [vmem:[%s3830_s2 + $0x428] sm:$0xff] }
 0x202   :  { %2723 = vmatpush3.bf16.msra.mxu1 %v2720_v26  ;;  %2447 = vmatmul.mubr.f32.gmra.mrb[2].mxu0 %v3456_v46  ;;  %v3561_v36 = vpop.f32.mrb[36].mxu1  ;;  %v1892_v46 = vld [vmem:[%s3830_s2 + $0x2e0] sm:$0xff]  ;;  %v2860_v26 = vpack.c.bf16 %v1917_v24, %v1916_v23 }
 0x203   :  { %2795 = vmatpush3.bf16.msra.mxu0 %v2792_v28  ;;  %2481 = vmatprep.mubr.f32.mxu0 %v3476_v56  ;;  %v3567_v38 = vpop.f32.mrb[37].mxu1  ;;  %v1899_v56 = vld [vmem:[%s3830_s2 + $0x318] sm:$0xff]  ;;  %v1918_v28 = vld [vmem:[%s3830_s2 + $0x3b0] sm:$0xff] }
 0x204   :  { %2797 = vmatprep.subr.bf16.mxu0 %v2796_v33  ;;  %v2824_v57 = vpack.c.bf16 %v1899_v56, %v1898_v55 }
 0x205   :  { %2368 = vmatmul.mubr.f32.vlgmr.msra.gmra.mrb[40].mxu1 %v3377_v5  ;;  %v1890_v5 = vld [vmem:[%s3830_s2 + $0x2d0] sm:$0xff] }
 0x206   :  { %2370 = vmatprep.mubr.f32.mxu1 %v3392_v13  ;;  %v3577_v42 = vpop.f32.mrb[38].mxu1  ;;  %v2808_v13 = vpack.c.bf16 %v1891_v45, %v1890_v5  ;;  %v1928_v5 = vld [vmem:[%s3830_s2 + $0x400] sm:$0xff]  ;;  %v1929_v45 = vld [vmem:[%s3830_s2 + $0x408] sm:$0xff] }
 0x207   :  { %2799 = vmatpush3.bf16.msra.mxu0 %v2796_v33  ;;  %v3579_v43 = vpop.f32.mrb[39].mxu1 }
 0x208   :  { %2801 = vmatprep.subr.bf16.mxu0 %v2800_v39 }
 0x209   :  { %2371 = vmatmul.mubr.f32.gmra.mrb[42].mxu1 %v3390_v12  ;;  %v2812_v12 = vpack.c.bf16 %v1893_v47, %v1892_v46  ;;  %v1930_v46 = vld [vmem:[%s3830_s2 + $0x410] sm:$0xff]  ;;  %v1931_v47 = vld [vmem:[%s3830_s2 + $0x418] sm:$0xff] }
 0x20b   :  { %2803 = vmatpush3.bf16.msra.mxu0 %v2800_v39  ;;  %v2876_v39 = vpack.c.bf16 %v1925_v37, %v1924_v35  ;;  %v1609_v35 = vld [vmem:[%s3835_s7 + $0x68] sm:$0xff]  ;;  %v1516_v37 = vld [vmem:[%s3833_s5] sm:$0x1f] }
 0x20c   :  { %2805 = vmatprep.subr.bf16.mxu0 %v2804_v44 }
 0x20f   :  { %2807 = vmatpush3.bf16.msra.mxu0 %v2804_v44  ;;  %v2880_v44 = vpack.c.bf16 %v1927_v41, %v1926_v40  ;;  %v1604_v41 = vld [vmem:[%s3835_s7 + $0x40] sm:$0xff] }
 0x210   :  { %2809 = vmatprep.subr.bf16.mxu0 %v2808_v13 }
 0x213   :  { %2811 = vmatpush3.bf16.msra.mxu0 %v2808_v13  ;;  %v2884_v13 = vpack.c.bf16 %v1929_v45, %v1928_v5  ;;  %v1599_v45 = vld [vmem:[%s3835_s7 + $0x18] sm:$0xff] }
 0x214   :  { %2813 = vmatprep.subr.bf16.mxu0 %v2812_v12 }
 0x217   :  { %2815 = vmatpush3.bf16.msra.mxu0 %v2812_v12  ;;  %v2888_v12 = vpack.c.bf16 %v1931_v47, %v1930_v46  ;;  %v1598_v47 = vld [vmem:[%s3835_s7 + $0x10] sm:$0xff] }
 0x218   :  { %2817 = vmatprep.subr.bf16.mxu0 %v2816_v50 }
 0x21b   :  { %2819 = vmatpush3.bf16.msra.mxu0 %v2816_v50  ;;  %v2892_v50 = vpack.c.bf16 %v1933_v49, %v1932_v48  ;;  %v1607_v48 = vld [vmem:[%s3835_s7 + $0x58] sm:$0xff] }
 0x21c   :  { %2821 = vmatprep.subr.bf16.mxu0 %v2820_v53  ;;  %v1611_v49 = vld [vmem:[%s3835_s7 + $0x78] sm:$0xff] }
 0x21e   :  { %2482 = vmatmul.mubr.f32.vlgmr.msra.gmra.mrb[0].mxu0 %v3474_v54  ;;  %v2832_v54 = vpack.c.bf16 %v1903_v63, %v1902_v61  ;;  %v1943_v61 = vld [vmem:[%s3830_s2 + $0x478] sm:$0xff] }
 0x21f   :  { %2823 = vmatpush3.bf16.msra.mxu0 %v2820_v53  ;;  %2484 = vmatprep.mubr.f32.mxu0 %v3492_v0  ;;  %v1904_v0 = vld [vmem:[%s3830_s2 + $0x340] sm:$0xff]  ;;  %v1937_v53 = vld [vmem:[%s3830_s2 + $0x448] sm:$0xff] }
 0x220   :  { %2825 = vmatprep.subr.bf16.mxu0 %v2824_v57  ;;  %v2836_v2 = vpack.c.bf16 %v1905_v1, %v1904_v0  ;;  %v3006_v0 = vmov 0.0|0.0  }
 0x221   :  { %2916 = vmatprep.subr.bf16.mxu1 %v3006_v0 }
 0x222   :  { %2485 = vmatmul.mubr.f32.gmra.mrb[2].mxu0 %v3490_v62  ;;  %v1906_v62 = vld [vmem:[%s3830_s2 + $0x350] sm:$0xff] }
 0x223   :  { %2827 = vmatpush3.bf16.msra.mxu0 %v2824_v57  ;;  %2519 = vmatprep.mubr.f32.mxu0 %v3508_v9  ;;  %v2840_v4 = vpack.c.bf16 %v1907_v3, %v1906_v62  ;;  %v2844_v9 = vpack.c.bf16 %v1909_v8, %v1908_v6  ;;  %v1940_v57 = vld [vmem:[%s3830_s2 + $0x460] sm:$0xff]  ;;  %v3008_v3 = vmov 0.0   ;;  %v653_v6 = vpop.permute.xlu1 %652 }
 0x224   :  { %2829 = vmatprep.subr.bf16.mxu0 %v2828_v60  ;;  %v2908_v59 = vpack.c.bf16 %v1941_v58, %v1940_v57  ;;  %2609 = vmatprep.mubr.msk.f32.mxu1 %vm3007_vm3, %v3008_v3 }
 0x227   :  { %2831 = vmatpush3.bf16.msra.mxu0 %v2828_v60  ;;  %v1942_v60 = vld [vmem:[%s3830_s2 + $0x470] sm:$0xff] }
 0x228   :  { %2833 = vmatprep.subr.bf16.mxu0 %v2832_v54  ;;  %v2912_v63 = vpack.c.bf16 %v1943_v61, %v1942_v60 }
 0x22b   :  { %2835 = vmatpush3.bf16.msra.mxu0 %v2832_v54 }
 0x22c   :  { %2837 = vmatprep.subr.bf16.mxu0 %v2836_v2 }
 0x22f   :  { %2839 = vmatpush3.bf16.msra.mxu0 %v2836_v2 }
 0x230   :  { %2841 = vmatprep.subr.bf16.mxu0 %v2840_v4 }
 0x233   :  { %2843 = vmatpush3.bf16.msra.mxu0 %v2840_v4  ;;  %v643_v4 = vpop.permute.xlu0 %642 }
 0x234   :  { %2845 = vmatprep.subr.bf16.mxu0 %v2844_v9 }
 0x237   :  { %2847 = vmatpush3.bf16.msra.mxu0 %v2844_v9  ;;  %v648_v8 = vpop.permute.xlu0 %647 }
 0x238   :  { %2849 = vmatprep.subr.bf16.mxu0 %v2848_v14 }
 0x23b   :  { %2851 = vmatpush3.bf16.msra.mxu0 %v2848_v14 }
 0x23c   :  { %2853 = vmatprep.subr.bf16.mxu0 %v2852_v18 }
 0x23e   :  { %2520 = vmatmul.mubr.f32.vlgmr.msra.gmra.mrb[0].mxu0 %v3506_v7  ;;  %v2864_v7 = vpack.c.bf16 %v1919_v29, %v1918_v28  ;;  %v1597_v28 = vld [vmem:[%s3835_s7 + $0x8] sm:$0xff] }
 0x23f   :  { %2855 = vmatpush3.bf16.msra.mxu0 %v2852_v18  ;;  %2522 = vmatprep.mubr.f32.mxu0 %v3524_v19  ;;  %v1920_v19 = vld [vmem:[%s3830_s2 + $0x3c0] sm:$0xff]  ;;  %v1601_v29 = vld [vmem:[%s3835_s7 + $0x28] sm:$0xff] }
 0x240   :  { %2857 = vmatprep.subr.bf16.mxu0 %v2856_v22  ;;  %v2868_v33 = vpack.c.bf16 %v1921_v30, %v1920_v19  ;;  %v2922_v30 = vpack.c.bf16 %v1601_v29, %v1597_v28 }
 0x242   :  { %2523 = vmatmul.mubr.f32.gmra.mrb[2].mxu0 %v3522_v17  ;;  %v1922_v17 = vld [vmem:[%s3830_s2 + $0x3d0] sm:$0xff] }
 0x243   :  { %2859 = vmatpush3.bf16.msra.mxu0 %v2856_v22  ;;  %2557 = vmatprep.mubr.f32.mxu0 %v3540_v27  ;;  %v1923_v27 = vld [vmem:[%s3830_s2 + $0x3d8] sm:$0xff] }
 0x244   :  { %2861 = vmatprep.subr.bf16.mxu0 %v2860_v26  ;;  %v2872_v34 = vpack.c.bf16 %v1923_v27, %v1922_v17  ;;  %v1600_v17 = vld [vmem:[%s3835_s7 + $0x20] sm:$0xff] }
 0x247   :  { %2863 = vmatpush3.bf16.msra.mxu0 %v2860_v26 }
 0x248   :  { %2865 = vmatprep.subr.bf16.mxu0 %v2864_v7 }
 0x24b   :  { %2867 = vmatpush3.bf16.msra.mxu0 %v2864_v7 }
 0x24c   :  { %2869 = vmatprep.subr.bf16.mxu0 %v2868_v33 }
 0x24f   :  { %2871 = vmatpush3.bf16.msra.mxu0 %v2868_v33  ;;  %v1596_v33 = vld [vmem:[%s3835_s7] sm:$0xff] }
 0x250   :  { %2873 = vmatprep.subr.bf16.mxu0 %v2872_v34 }
 0x253   :  { %2875 = vmatpush3.bf16.msra.mxu0 %v2872_v34  ;;  %v1605_v34 = vld [vmem:[%s3835_s7 + $0x48] sm:$0xff] }
 0x254   :  { %2877 = vmatprep.subr.bf16.mxu0 %v2876_v39  ;;  %v2926_v40 = vpack.c.bf16 %v1609_v35, %v1605_v34 }
 0x257   :  { %2879 = vmatpush3.bf16.msra.mxu0 %v2876_v39  ;;  %v2924_v39 = vpack.c.bf16 %v1600_v17, %v1596_v33 }
 0x258   :  { %2881 = vmatprep.subr.bf16.mxu0 %v2880_v44 }
 0x25b   :  { %2883 = vmatpush3.bf16.msra.mxu0 %v2880_v44  ;;  %v1608_v44 = vld [vmem:[%s3835_s7 + $0x60] sm:$0xff] }
 0x25c   :  { %2885 = vmatprep.subr.bf16.mxu0 %v2884_v13  ;;  %v2928_v5 = vpack.c.bf16 %v1608_v44, %v1604_v41 }
 0x25e   :  { %2558 = vmatmul.mubr.f32.vlgmr.msra.gmra.mrb[0].mxu0 %v3538_v25  ;;  %v2896_v25 = vpack.c.bf16 %v1935_v52, %v1934_v51 }
 0x25f   :  { %2887 = vmatpush3.bf16.msra.mxu0 %v2884_v13  ;;  %2560 = vmatprep.mubr.f32.mxu0 %v3551_v32  ;;  %v1936_v32 = vld [vmem:[%s3830_s2 + $0x440] sm:$0xff]  ;;  %v1603_v13 = vld [vmem:[%s3835_s7 + $0x38] sm:$0xff] }
 0x260   :  { %2889 = vmatprep.subr.bf16.mxu0 %v2888_v12  ;;  %v2900_v55 = vpack.c.bf16 %v1937_v53, %v1936_v32  ;;  %v2930_v46 = vpack.c.bf16 %v1603_v13, %v1599_v45  ;;  %v2934_v53 = vpack.c.bf16 %v1611_v49, %v1607_v48 }
 0x262   :  { %2561 = vmatmul.mubr.f32.gmra.mrb[2].mxu0 %v3549_v31  ;;  %v1938_v31 = vld [vmem:[%s3830_s2 + $0x450] sm:$0xff] }
 0x263   :  { %2891 = vmatpush3.bf16.msra.mxu0 %v2888_v12  ;;  %2595 = vmatprep.mubr.f32.mxu0 %v3567_v38  ;;  %v1939_v38 = vld [vmem:[%s3830_s2 + $0x458] sm:$0xff]  ;;  %v1602_v12 = vld [vmem:[%s3835_s7 + $0x30] sm:$0xff] }
 0x264   :  { %2893 = vmatprep.subr.bf16.mxu0 %v2892_v50  ;;  %v2904_v56 = vpack.c.bf16 %v1939_v38, %v1938_v31  ;;  %v2932_v52 = vpack.c.bf16 %v1602_v12, %v1598_v47  ;;  %v1610_v31 = vld [vmem:[%s3835_s7 + $0x70] sm:$0xff] }
 0x267   :  { %2895 = vmatpush3.bf16.msra.mxu0 %v2892_v50  ;;  %v1521_v50 = vpop.permute.xlu0 %1520 }
 0x268   :  { %2897 = vmatprep.subr.bf16.mxu0 %v2896_v25 }
 0x26b   :  { %2899 = vmatpush3.bf16.msra.mxu0 %v2896_v25 }
 0x26c   :  { %2901 = vmatprep.subr.bf16.mxu0 %v2900_v55 }
 0x26f   :  { %2903 = vmatpush3.bf16.msra.mxu0 %v2900_v55  ;;  %v1606_v55 = vld [vmem:[%s3835_s7 + $0x50] sm:$0xff]  ;;  %s2981_s7 = scalar_lea.vmem %s1768_s16, 512 }
 0x270   :  { %2905 = vmatprep.subr.bf16.mxu0 %v2904_v56  ;;  %v2936_v38 = vpack.c.bf16 %v1610_v31, %v1606_v55  ;;  %p2982_p0 = scmp.ne.s32.totalorder %s1768_s16, %s2981_s7  ;;  %p2987_p2 = scmp.lt.s32.totalorder %s2981_s7, %s2981_s7 }
 0x272   :  { %p2988_p3 = por %p2987_p2, %p2986_p1 }
 0x273   :  { %2907 = vmatpush3.bf16.msra.mxu0 %v2904_v56 }
 0x274   :  { %2909 = vmatprep.subr.bf16.mxu0 %v2908_v59  ;;  %p2989_p4 = pnand %p2988_p3, %p2982_p0 }
 0x277   :  { %2911 = vmatpush3.bf16.msra.mxu0 %v2908_v59 }
 0x278   :  { %2913 = vmatprep.subr.bf16.mxu0 %v2912_v63 }
 0x27b   :  { %2915 = vmatpush3.bf16.msra.mxu0 %v2912_v63 }
 0x27e   :  { %2596 = vmatmul.mubr.f32.vlgmr.msra.gmra.mrb[0].mxu0 %v3561_v36  ;;  %v658_v36 = vpop.permute.xlu1 %657 }
 0x27f   :  { %2598 = vmatprep.mubr.f32.mxu0 %v3579_v43 }
 0x282   :  { %2599 = vmatmul.mubr.f32.gmra.mrb[2].mxu0 %v3577_v42 }
 0x2d8   :  { %v2369_v54 = vpop.f32.mrb[40].mxu1 }
 0x2d9   :  { %v853_v1 = vpop.f32.mrb[41].mxu1  ;;  %v2938_v9 = vadd.f32 %v2369_v54, %v648_v8 }
 0x2da   :  { %v2940_v10 = vadd.f32 %v853_v1, %v643_v4 }
 0x2dc   :  { %v2372_v2 = vpop.f32.mrb[42].mxu1 }
 0x2dd   :  { %v863_v62 = vpop.f32.mrb[43].mxu1  ;;  %v2942_v15 = vadd.f32 %v2372_v2, %v658_v36 }
 0x2de   :  { %v2944_v18 = vadd.f32 %v863_v62, %v653_v6 }
 0x351   :  { %v2597_v11 = vpop.f32.mrb[0].mxu0 }
 0x352   :  { %v2939_v43 = vadd.f32 %v2938_v9, %v2597_v11  ;;  %v1489_v14 = vpop.f32.mrb[1].mxu0 }
 0x353   :  { %v2941_v42 = vadd.f32 %v2940_v10, %v1489_v14 }
 0x354   :  { %v1513_v16 = vmax.f32 %v2939_v43, 0.0 }
 0x355   :  { %v1512_v20 = vmax.f32 %v2941_v42, 0.0  ;;  %v2600_v21 = vpop.f32.mrb[2].mxu0 }
 0x356   :  { %v2943_v22 = vadd.f32 %v2942_v15, %v2600_v21  ;;  %v1499_v23 = vpop.f32.mrb[3].mxu0 }
 0x357   :  { %v2917_v24 = vpack.c.bf16 %v1513_v16, %v1512_v20  ;;  %v2945_v26 = vadd.f32 %v2944_v18, %v1499_v23 }
 0x358   :  { %v1515_v7 = vmax.f32 %v2943_v22, 0.0 }
 0x359   :  { %v1514_v19 = vmax.f32 %v2945_v26, 0.0  ;;  %2918 = vmatpush3.bf16.msra.mxu1 %v2917_v24 }
 0x35a   :  { %2919 = vmatprep.subr.bf16.mxu1 %v3006_v0 }
 0x35b   :  { %v2920_v27 = vpack.c.bf16 %v1515_v7, %v1514_v19 }
 0x35d   :  { %2921 = vmatpush3.bf16.msra.mxu1 %v2920_v27 }
 0x35e   :  { %2923 = vmatprep.subr.bf16.mxu1 %v2922_v30 }
 0x360   :  { %2610 = vmatmul.mubr.msk.f32.vlgmr.msra.gmra.mrb[44].mxu1 %vm181_vm2, %v1516_v37 }
 0x361   :  { %2925 = vmatpush1.bf16.msra.mxu1 %v2924_v39  ;;  %1679 = vmatprep.mubr.f32.mxu1 %v3008_v3 }
 0x362   :  { %2927 = vmatprep.subr.bf16.mxu1 %v2926_v40 }
 0x365   :  { %2929 = vmatpush1.bf16.msra.mxu1 %v2928_v5 }
 0x366   :  { %2931 = vmatprep.subr.bf16.mxu1 %v2930_v46 }
 0x433   :  { %v1592_v51 = vpop.f32.mrb[44].mxu1 }
 0x434   :  { %v1593_v25 = vadd.f32 %v1592_v51, %v1521_v50  ;;  %v2611_v32 = vpop.f32.mrb[45].mxu1 }
 0x436   :  { %1945 = vmatmul.mubr.msk.f32.vlgmr.msra.gmra.mrb[46].mxu1 %vm181_vm2, %v1593_v25 }
 0x437   :  { %2933 = vmatpush1.bf16.msra.mxu1 %v2932_v52  ;;  %1750 = vmatprep.mubr.f32.mxu1 %v3008_v3 }
 0x438   :  { %2935 = vmatprep.subr.bf16.mxu1 %v2934_v53 }
 0x43b   :  { %2937 = vmatpush1.bf16.msra.mxu1 %v2936_v38 }
 0x43e   :  { %1946 = vmatmul.mubr.msk.f32.vlgmr.msra.gmra.mrb[48].mxu1 %vm181_vm2, %v1593_v25 }
 0x509   :  { %v1681_v56 = vpop.f32.mrb[46].mxu1 }
 0x50a   :  { %1757 = vst [vmem:[#allocation2] sm:$0x1f] %v1681_v56  ;;  %v1683_v57 = vpop.f32.mrb[47].mxu1 }
 0x50b   :  { %1758 = vst [vmem:[#allocation2 + $0x8] sm:$0x1f] %v1683_v57 }
 0x511   :  { %v1752_v58 = vpop.f32.mrb[48].mxu1 }
 0x512   :  { %1759 = vst [vmem:[#allocation2 + $0x10] sm:$0x1f] %v1752_v58  ;;  %v1754_v59 = vpop.f32.mrb[49].mxu1 }
 0x513   :  { %1760 = vst [vmem:[#allocation2 + $0x18] sm:$0x1f] %v1754_v59 }
 0x514   :  { %2992 = shalt.err (!%p2989_p4)
}
 0x515   :  { %s2993_s19 = scalar_lea.hbm %s3836_s8, 512 }
 0x516   :  { %p2994_p5 = scmp.ne.s32.totalorder %s3836_s8, %s2993_s19  ;;  %p2997_p6 = scmp.lt.u32.totalorder %s2993_s19, %s3836_s8 }
 0x518   :  { %p2999_p7 = pnand %p2997_p6, %p2994_p5 }
 0x51a   :  { %3002 = shalt.err (!%p2999_p7)
}
 0x51b   :  { %1770 = dma.vmem_to_hbm [thread:$0]  %s1768_s16, 512, %s3836_s8, [#allocation3]  }
 0x51c   :  { %3003 = dma.done.wait [#allocation3], 512  }
 0x51d   :  { %3004 = vsyncadd [#allocation3], 4294966784 }
 0x51e   :  { %1774 = vsyncpa [#allocation3], 1 }

</bundles_post_ra>
